<compile_context>
chip_gen: v7x
topology: tpu7x:2x2x1
jax: 0.10.0
libtpu: 0.0.40
codegen_flags: <defaults>
</compile_context>

<pallas_src>
import jax
import jax.numpy as jnp
from jax.experimental import pallas as pl
from jax.experimental.pallas import tpu as pltpu


def _reward_lstm_kernel(x_ref, wih_ref, whh_ref, b_ref, wfc_ref, bfc_ref,
                        out_ref):
    # x_ref:   (T*B, I)   bf16, time-major flat
    # wih_ref: (I, 4H)    bf16   (gate blocks permuted to i,f,o,g)
    # whh_ref: (H, 4H)    bf16
    # b_ref:   (1, 4H)    f32    (b_ih + b_hh fused)
    # wfc_ref: (H, O_pad) bf16   (zero-padded to 128 lanes)
    # bfc_ref: (1, O_pad) f32
    # out_ref: (B, O_pad) f32
    TB, _ = x_ref.shape
    H4 = whh_ref.shape[1]
    H = H4 // 4
    B = out_ref.shape[0]
    T = TB // B

    # ---- Hoisted input projection (off the serial critical path) ----------
    # One (T*B, I) x (I, 4H) bf16 MXU matmul with f32 accumulation + bias.
    xw = (jnp.dot(x_ref[...], wih_ref[...],
                  preferred_element_type=jnp.float32)
          + b_ref[...])                           # (T*B, 4H) f32, time-major

    whh = whh_ref[...]                            # (H, 4H) bf16, vreg-resident

    h = jnp.zeros((B, H), jnp.float32)
    c = jnp.zeros((B, H), jnp.float32)

    # ---- Serial recurrence, fully unrolled (T static & tiny) --------------
    for t in range(T):
        # Recurrent dot: bf16 operands, f32 accumulation (single MXU pass).
        rec = jnp.dot(h.astype(jnp.bfloat16), whh,
                      preferred_element_type=jnp.float32)       # (B, 4H) f32
        # Time-major flat layout -> static contiguous sublane slice.
        gates = xw[t * B:(t + 1) * B, :] + rec                  # (B, 4H) f32

        # Full 4H(=128)-lane transcendentals, H-wide lane slices afterwards.
        sig = jax.nn.sigmoid(gates)
        tnh = jnp.tanh(gates)
        i_g = sig[:, 0 * H:1 * H]
        f_g = sig[:, 1 * H:2 * H]
        o_g = sig[:, 2 * H:3 * H]
        g_g = tnh[:, 3 * H:4 * H]

        c = f_g * c + i_g * g_g
        h = o_g * jnp.tanh(c)

    # ---- Final FC + sigmoid (lane-dense padded output) ---------------------
    logits = (jnp.dot(h.astype(jnp.bfloat16), wfc_ref[...],
                      preferred_element_type=jnp.float32)
              + bfc_ref[...])
    out_ref[...] = jax.nn.sigmoid(logits).astype(out_ref.dtype)


def _permute_gate_blocks(m, H):
    """Reorder PyTorch LSTM gate blocks (i, f, g, o) -> (i, f, o, g) along axis 0."""
    return jnp.concatenate([m[0:2 * H], m[3 * H:4 * H], m[2 * H:3 * H]], axis=0)


def reward_lstm_forward(x, params):
    """x: (B, T, input_size) float32 (PyTorch batch_first layout)."""
    w_ih, w_hh, b_ih, b_hh, w_fc, b_fc = (
        params["w_ih"], params["w_hh"], params["b_ih"], params["b_hh"],
        params["w_fc"], params["b_fc"])
    B, T, I = x.shape
    H = w_hh.shape[1]
    O = w_fc.shape[0]
    O_pad = ((O + 127) // 128) * 128          # lane-dense output width

    # Weight glue: permute gate blocks to (i,f,o,g), pre-transpose for
    # x @ W^T style matmuls, fuse biases. MXU operands in bf16, biases in f32.
    wih_t = jnp.transpose(_permute_gate_blocks(w_ih, H)).astype(jnp.bfloat16)  # (I, 4H)
    whh_t = jnp.transpose(_permute_gate_blocks(w_hh, H)).astype(jnp.bfloat16)  # (H, 4H)
    b = _permute_gate_blocks(b_ih + b_hh, H).reshape(1, 4 * H).astype(jnp.float32)

    wfc_t = jnp.zeros((H, O_pad), jnp.bfloat16).at[:, :O].set(
        jnp.transpose(w_fc).astype(jnp.bfloat16))                              # (H, O_pad)
    bfc = jnp.zeros((1, O_pad), jnp.float32).at[:, :O].set(
        b_fc.astype(jnp.float32))                                              # (1, O_pad)

    # Time-major flat input (one tiny wrapper-side transpose — layout
    # plumbing, not compute-hoisting): (T*B, I) bf16.
    x_tm = jnp.transpose(x, (1, 0, 2)).reshape(T * B, I).astype(jnp.bfloat16)

    vmem = pl.BlockSpec(memory_space=pltpu.MemorySpace.VMEM)
    out_pad = pl.pallas_call(
        _reward_lstm_kernel,
        out_shape=jax.ShapeDtypeStruct((B, O_pad), jnp.float32),
        in_specs=[vmem] * 6,
        out_specs=vmem,
    )(x_tm, wih_t, whh_t, b, wfc_t, bfc)
    return out_pad[:, :O]


def reward_lstm_reference(x, params):
    """Pure-JAX f32 reference of the PyTorch forward (for correctness check)."""
    w_ih, w_hh, b_ih, b_hh, w_fc, b_fc = (
        params["w_ih"], params["w_hh"], params["b_ih"], params["b_hh"],
        params["w_fc"], params["b_fc"])
    B, T, _ = x.shape
    H = w_hh.shape[1]

    def step(carry, x_t):
        h, c = carry
        gates = x_t @ w_ih.T + h @ w_hh.T + b_ih + b_hh
        i = jax.nn.sigmoid(gates[:, 0 * H:1 * H])
        f = jax.nn.sigmoid(gates[:, 1 * H:2 * H])
        g = jnp.tanh(gates[:, 2 * H:3 * H])
        o = jax.nn.sigmoid(gates[:, 3 * H:4 * H])
        c = f * c + i * g
        h = o * jnp.tanh(c)
        return (h, c), None

    h0 = jnp.zeros((B, H), jnp.float32)
    c0 = jnp.zeros((B, H), jnp.float32)
    (hn, _), _ = jax.lax.scan(step, (h0, c0), jnp.transpose(x, (1, 0, 2)))
    return jax.nn.sigmoid(hn @ w_fc.T + b_fc)


def init_params(key, input_size, hidden_size, output_size):
    ks = jax.random.split(key, 6)
    s = 1.0 / jnp.sqrt(hidden_size)   # PyTorch default uniform(-1/sqrt(H), 1/sqrt(H))
    u = lambda k, shape: jax.random.uniform(k, shape, jnp.float32, -s, s)
    return {
        "w_ih": u(ks[0], (4 * hidden_size, input_size)),
        "w_hh": u(ks[1], (4 * hidden_size, hidden_size)),
        "b_ih": u(ks[2], (4 * hidden_size,)),
        "b_hh": u(ks[3], (4 * hidden_size,)),
        "w_fc": u(ks[4], (output_size, hidden_size)),
        "b_fc": u(ks[5], (output_size,)),
    }


if __name__ == "__main__":
    B, T, INPUT, HIDDEN, OUTPUT = 2, 8, 16, 32, 4

    key = jax.random.PRNGKey(0)
    kx, kp = jax.random.split(key)
    x = jax.random.normal(kx, (B, T, INPUT), jnp.float32)
    params = init_params(kp, INPUT, HIDDEN, OUTPUT)

    out = reward_lstm_forward(x, params)
    out = jax.block_until_ready(out)

    ref = reward_lstm_reference(x, params)
    assert out.shape == (B, OUTPUT)
    # bf16 MXU operands (f32 accumulation / gate math) -> relaxed tolerance.
    assert jnp.allclose(out, ref, atol=1e-2, rtol=1e-2), (out, ref)

    print("KERNEL_OK")
</pallas_src>

<mosaic_0001>
module attributes {stable_mosaic.version = 11 : i64} {
  func.func @_reward_lstm_kernel(%arg0: memref<16x16xbf16, #tpu.memory_space<vmem>>, %arg1: memref<16x128xbf16, #tpu.memory_space<vmem>>, %arg2: memref<32x128xbf16, #tpu.memory_space<vmem>>, %arg3: memref<1x128xf32, #tpu.memory_space<vmem>>, %arg4: memref<32x128xbf16, #tpu.memory_space<vmem>>, %arg5: memref<1x128xf32, #tpu.memory_space<vmem>>, %arg6: memref<2x128xf32, #tpu.memory_space<vmem>>) attributes {dimension_semantics = [], scalar_prefetch = 0 : i64, scratch_operands = 0 : i64, tpu.core_type = #tpu.core_type<tc>} {
    %c0 = arith.constant 0 : index
    %c0_0 = arith.constant 0 : index
    %0 = vector.load %arg0[%c0, %c0_0] : memref<16x16xbf16, #tpu.memory_space<vmem>>, vector<16x16xbf16>
    %c0_1 = arith.constant 0 : index
    %c0_2 = arith.constant 0 : index
    %1 = vector.load %arg1[%c0_1, %c0_2] : memref<16x128xbf16, #tpu.memory_space<vmem>>, vector<16x128xbf16>
    %cst = arith.constant dense<0.000000e+00> : vector<16x128xf32>
    %2 = tpu.matmul %0, %1, %cst {dimension_numbers = #tpu.dot_dimension_numbers<[1], [0], [0], [1], [0, 0, 1, 1], [], []>} : vector<16x16xbf16>, vector<16x128xbf16>, vector<16x128xf32> -> vector<16x128xf32>
    %c0_3 = arith.constant 0 : index
    %c0_4 = arith.constant 0 : index
    %3 = vector.load %arg3[%c0_3, %c0_4] : memref<1x128xf32, #tpu.memory_space<vmem>>, vector<1x128xf32>
    %4 = vector.broadcast %3 : vector<1x128xf32> to vector<16x128xf32>
    %5 = arith.addf %2, %4 : vector<16x128xf32>
    %c0_5 = arith.constant 0 : index
    %c0_6 = arith.constant 0 : index
    %6 = vector.load %arg2[%c0_5, %c0_6] : memref<32x128xbf16, #tpu.memory_space<vmem>>, vector<32x128xbf16>
    %cst_7 = arith.constant 0.000000e+00 : f32
    %7 = vector.broadcast %cst_7 : f32 to vector<2x32xf32>
    %cst_8 = arith.constant 0.000000e+00 : f32
    %8 = vector.broadcast %cst_8 : f32 to vector<2x32xf32>
    %9 = arith.truncf %7 : vector<2x32xf32> to vector<2x32xbf16>
    %cst_9 = arith.constant dense<0.000000e+00> : vector<2x128xf32>
    %10 = tpu.matmul %9, %6, %cst_9 {dimension_numbers = #tpu.dot_dimension_numbers<[1], [0], [0], [1], [0, 0, 1, 1], [], []>} : vector<2x32xbf16>, vector<32x128xbf16>, vector<2x128xf32> -> vector<2x128xf32>
    %11 = vector.extract_strided_slice %5 {offsets = [0, 0], sizes = [2, 128], strides = [1, 1]} : vector<16x128xf32> to vector<2x128xf32>
    %12 = arith.addf %11, %10 : vector<2x128xf32>
    %13 = arith.negf %12 : vector<2x128xf32>
    %14 = math.exp %13 : vector<2x128xf32>
    %cst_10 = arith.constant 1.000000e+00 : f32
    %15 = vector.broadcast %cst_10 : f32 to vector<2x128xf32>
    %16 = arith.addf %15, %14 : vector<2x128xf32>
    %17 = arith.divf %15, %16 : vector<2x128xf32>
    %18 = math.tanh %12 : vector<2x128xf32>
    %19 = vector.extract_strided_slice %17 {offsets = [0, 0], sizes = [2, 32], strides = [1, 1]} : vector<2x128xf32> to vector<2x32xf32>
    %20 = vector.extract_strided_slice %17 {offsets = [0, 32], sizes = [2, 32], strides = [1, 1]} : vector<2x128xf32> to vector<2x32xf32>
    %21 = vector.extract_strided_slice %17 {offsets = [0, 64], sizes = [2, 32], strides = [1, 1]} : vector<2x128xf32> to vector<2x32xf32>
    %22 = vector.extract_strided_slice %18 {offsets = [0, 96], sizes = [2, 32], strides = [1, 1]} : vector<2x128xf32> to vector<2x32xf32>
    %23 = arith.mulf %20, %8 : vector<2x32xf32>
    %24 = arith.mulf %19, %22 : vector<2x32xf32>
    %25 = arith.addf %23, %24 : vector<2x32xf32>
    %26 = math.tanh %25 : vector<2x32xf32>
    %27 = arith.mulf %21, %26 : vector<2x32xf32>
    %28 = arith.truncf %27 : vector<2x32xf32> to vector<2x32xbf16>
    %cst_11 = arith.constant dense<0.000000e+00> : vector<2x128xf32>
    %29 = tpu.matmul %28, %6, %cst_11 {dimension_numbers = #tpu.dot_dimension_numbers<[1], [0], [0], [1], [0, 0, 1, 1], [], []>} : vector<2x32xbf16>, vector<32x128xbf16>, vector<2x128xf32> -> vector<2x128xf32>
    %30 = vector.extract_strided_slice %5 {offsets = [2, 0], sizes = [2, 128], strides = [1, 1]} : vector<16x128xf32> to vector<2x128xf32>
    %31 = arith.addf %30, %29 : vector<2x128xf32>
    %32 = arith.negf %31 : vector<2x128xf32>
    %33 = math.exp %32 : vector<2x128xf32>
    %cst_12 = arith.constant 1.000000e+00 : f32
    %34 = vector.broadcast %cst_12 : f32 to vector<2x128xf32>
    %35 = arith.addf %34, %33 : vector<2x128xf32>
    %36 = arith.divf %34, %35 : vector<2x128xf32>
    %37 = math.tanh %31 : vector<2x128xf32>
    %38 = vector.extract_strided_slice %36 {offsets = [0, 0], sizes = [2, 32], strides = [1, 1]} : vector<2x128xf32> to vector<2x32xf32>
    %39 = vector.extract_strided_slice %36 {offsets = [0, 32], sizes = [2, 32], strides = [1, 1]} : vector<2x128xf32> to vector<2x32xf32>
    %40 = vector.extract_strided_slice %36 {offsets = [0, 64], sizes = [2, 32], strides = [1, 1]} : vector<2x128xf32> to vector<2x32xf32>
    %41 = vector.extract_strided_slice %37 {offsets = [0, 96], sizes = [2, 32], strides = [1, 1]} : vector<2x128xf32> to vector<2x32xf32>
    %42 = arith.mulf %39, %25 : vector<2x32xf32>
    %43 = arith.mulf %38, %41 : vector<2x32xf32>
    %44 = arith.addf %42, %43 : vector<2x32xf32>
    %45 = math.tanh %44 : vector<2x32xf32>
    %46 = arith.mulf %40, %45 : vector<2x32xf32>
    %47 = arith.truncf %46 : vector<2x32xf32> to vector<2x32xbf16>
    %cst_13 = arith.constant dense<0.000000e+00> : vector<2x128xf32>
    %48 = tpu.matmul %47, %6, %cst_13 {dimension_numbers = #tpu.dot_dimension_numbers<[1], [0], [0], [1], [0, 0, 1, 1], [], []>} : vector<2x32xbf16>, vector<32x128xbf16>, vector<2x128xf32> -> vector<2x128xf32>
    %49 = vector.extract_strided_slice %5 {offsets = [4, 0], sizes = [2, 128], strides = [1, 1]} : vector<16x128xf32> to vector<2x128xf32>
    %50 = arith.addf %49, %48 : vector<2x128xf32>
    %51 = arith.negf %50 : vector<2x128xf32>
    %52 = math.exp %51 : vector<2x128xf32>
    %cst_14 = arith.constant 1.000000e+00 : f32
    %53 = vector.broadcast %cst_14 : f32 to vector<2x128xf32>
    %54 = arith.addf %53, %52 : vector<2x128xf32>
    %55 = arith.divf %53, %54 : vector<2x128xf32>
    %56 = math.tanh %50 : vector<2x128xf32>
    %57 = vector.extract_strided_slice %55 {offsets = [0, 0], sizes = [2, 32], strides = [1, 1]} : vector<2x128xf32> to vector<2x32xf32>
    %58 = vector.extract_strided_slice %55 {offsets = [0, 32], sizes = [2, 32], strides = [1, 1]} : vector<2x128xf32> to vector<2x32xf32>
    %59 = vector.extract_strided_slice %55 {offsets = [0, 64], sizes = [2, 32], strides = [1, 1]} : vector<2x128xf32> to vector<2x32xf32>
    %60 = vector.extract_strided_slice %56 {offsets = [0, 96], sizes = [2, 32], strides = [1, 1]} : vector<2x128xf32> to vector<2x32xf32>
    %61 = arith.mulf %58, %44 : vector<2x32xf32>
    %62 = arith.mulf %57, %60 : vector<2x32xf32>
    %63 = arith.addf %61, %62 : vector<2x32xf32>
    %64 = math.tanh %63 : vector<2x32xf32>
    %65 = arith.mulf %59, %64 : vector<2x32xf32>
    %66 = arith.truncf %65 : vector<2x32xf32> to vector<2x32xbf16>
    %cst_15 = arith.constant dense<0.000000e+00> : vector<2x128xf32>
    %67 = tpu.matmul %66, %6, %cst_15 {dimension_numbers = #tpu.dot_dimension_numbers<[1], [0], [0], [1], [0, 0, 1, 1], [], []>} : vector<2x32xbf16>, vector<32x128xbf16>, vector<2x128xf32> -> vector<2x128xf32>
    %68 = vector.extract_strided_slice %5 {offsets = [6, 0], sizes = [2, 128], strides = [1, 1]} : vector<16x128xf32> to vector<2x128xf32>
    %69 = arith.addf %68, %67 : vector<2x128xf32>
    %70 = arith.negf %69 : vector<2x128xf32>
    %71 = math.exp %70 : vector<2x128xf32>
    %cst_16 = arith.constant 1.000000e+00 : f32
    %72 = vector.broadcast %cst_16 : f32 to vector<2x128xf32>
    %73 = arith.addf %72, %71 : vector<2x128xf32>
    %74 = arith.divf %72, %73 : vector<2x128xf32>
    %75 = math.tanh %69 : vector<2x128xf32>
    %76 = vector.extract_strided_slice %74 {offsets = [0, 0], sizes = [2, 32], strides = [1, 1]} : vector<2x128xf32> to vector<2x32xf32>
    %77 = vector.extract_strided_slice %74 {offsets = [0, 32], sizes = [2, 32], strides = [1, 1]} : vector<2x128xf32> to vector<2x32xf32>
    %78 = vector.extract_strided_slice %74 {offsets = [0, 64], sizes = [2, 32], strides = [1, 1]} : vector<2x128xf32> to vector<2x32xf32>
    %79 = vector.extract_strided_slice %75 {offsets = [0, 96], sizes = [2, 32], strides = [1, 1]} : vector<2x128xf32> to vector<2x32xf32>
    %80 = arith.mulf %77, %63 : vector<2x32xf32>
    %81 = arith.mulf %76, %79 : vector<2x32xf32>
    %82 = arith.addf %80, %81 : vector<2x32xf32>
    %83 = math.tanh %82 : vector<2x32xf32>
    %84 = arith.mulf %78, %83 : vector<2x32xf32>
    %85 = arith.truncf %84 : vector<2x32xf32> to vector<2x32xbf16>
    %cst_17 = arith.constant dense<0.000000e+00> : vector<2x128xf32>
    %86 = tpu.matmul %85, %6, %cst_17 {dimension_numbers = #tpu.dot_dimension_numbers<[1], [0], [0], [1], [0, 0, 1, 1], [], []>} : vector<2x32xbf16>, vector<32x128xbf16>, vector<2x128xf32> -> vector<2x128xf32>
    %87 = vector.extract_strided_slice %5 {offsets = [8, 0], sizes = [2, 128], strides = [1, 1]} : vector<16x128xf32> to vector<2x128xf32>
    %88 = arith.addf %87, %86 : vector<2x128xf32>
    %89 = arith.negf %88 : vector<2x128xf32>
    %90 = math.exp %89 : vector<2x128xf32>
    %cst_18 = arith.constant 1.000000e+00 : f32
    %91 = vector.broadcast %cst_18 : f32 to vector<2x128xf32>
    %92 = arith.addf %91, %90 : vector<2x128xf32>
    %93 = arith.divf %91, %92 : vector<2x128xf32>
    %94 = math.tanh %88 : vector<2x128xf32>
    %95 = vector.extract_strided_slice %93 {offsets = [0, 0], sizes = [2, 32], strides = [1, 1]} : vector<2x128xf32> to vector<2x32xf32>
    %96 = vector.extract_strided_slice %93 {offsets = [0, 32], sizes = [2, 32], strides = [1, 1]} : vector<2x128xf32> to vector<2x32xf32>
    %97 = vector.extract_strided_slice %93 {offsets = [0, 64], sizes = [2, 32], strides = [1, 1]} : vector<2x128xf32> to vector<2x32xf32>
    %98 = vector.extract_strided_slice %94 {offsets = [0, 96], sizes = [2, 32], strides = [1, 1]} : vector<2x128xf32> to vector<2x32xf32>
    %99 = arith.mulf %96, %82 : vector<2x32xf32>
    %100 = arith.mulf %95, %98 : vector<2x32xf32>
    %101 = arith.addf %99, %100 : vector<2x32xf32>
    %102 = math.tanh %101 : vector<2x32xf32>
    %103 = arith.mulf %97, %102 : vector<2x32xf32>
    %104 = arith.truncf %103 : vector<2x32xf32> to vector<2x32xbf16>
    %cst_19 = arith.constant dense<0.000000e+00> : vector<2x128xf32>
    %105 = tpu.matmul %104, %6, %cst_19 {dimension_numbers = #tpu.dot_dimension_numbers<[1], [0], [0], [1], [0, 0, 1, 1], [], []>} : vector<2x32xbf16>, vector<32x128xbf16>, vector<2x128xf32> -> vector<2x128xf32>
    %106 = vector.extract_strided_slice %5 {offsets = [10, 0], sizes = [2, 128], strides = [1, 1]} : vector<16x128xf32> to vector<2x128xf32>
    %107 = arith.addf %106, %105 : vector<2x128xf32>
    %108 = arith.negf %107 : vector<2x128xf32>
    %109 = math.exp %108 : vector<2x128xf32>
    %cst_20 = arith.constant 1.000000e+00 : f32
    %110 = vector.broadcast %cst_20 : f32 to vector<2x128xf32>
    %111 = arith.addf %110, %109 : vector<2x128xf32>
    %112 = arith.divf %110, %111 : vector<2x128xf32>
    %113 = math.tanh %107 : vector<2x128xf32>
    %114 = vector.extract_strided_slice %112 {offsets = [0, 0], sizes = [2, 32], strides = [1, 1]} : vector<2x128xf32> to vector<2x32xf32>
    %115 = vector.extract_strided_slice %112 {offsets = [0, 32], sizes = [2, 32], strides = [1, 1]} : vector<2x128xf32> to vector<2x32xf32>
    %116 = vector.extract_strided_slice %112 {offsets = [0, 64], sizes = [2, 32], strides = [1, 1]} : vector<2x128xf32> to vector<2x32xf32>
    %117 = vector.extract_strided_slice %113 {offsets = [0, 96], sizes = [2, 32], strides = [1, 1]} : vector<2x128xf32> to vector<2x32xf32>
    %118 = arith.mulf %115, %101 : vector<2x32xf32>
    %119 = arith.mulf %114, %117 : vector<2x32xf32>
    %120 = arith.addf %118, %119 : vector<2x32xf32>
    %121 = math.tanh %120 : vector<2x32xf32>
    %122 = arith.mulf %116, %121 : vector<2x32xf32>
    %123 = arith.truncf %122 : vector<2x32xf32> to vector<2x32xbf16>
    %cst_21 = arith.constant dense<0.000000e+00> : vector<2x128xf32>
    %124 = tpu.matmul %123, %6, %cst_21 {dimension_numbers = #tpu.dot_dimension_numbers<[1], [0], [0], [1], [0, 0, 1, 1], [], []>} : vector<2x32xbf16>, vector<32x128xbf16>, vector<2x128xf32> -> vector<2x128xf32>
    %125 = vector.extract_strided_slice %5 {offsets = [12, 0], sizes = [2, 128], strides = [1, 1]} : vector<16x128xf32> to vector<2x128xf32>
    %126 = arith.addf %125, %124 : vector<2x128xf32>
    %127 = arith.negf %126 : vector<2x128xf32>
    %128 = math.exp %127 : vector<2x128xf32>
    %cst_22 = arith.constant 1.000000e+00 : f32
    %129 = vector.broadcast %cst_22 : f32 to vector<2x128xf32>
    %130 = arith.addf %129, %128 : vector<2x128xf32>
    %131 = arith.divf %129, %130 : vector<2x128xf32>
    %132 = math.tanh %126 : vector<2x128xf32>
    %133 = vector.extract_strided_slice %131 {offsets = [0, 0], sizes = [2, 32], strides = [1, 1]} : vector<2x128xf32> to vector<2x32xf32>
    %134 = vector.extract_strided_slice %131 {offsets = [0, 32], sizes = [2, 32], strides = [1, 1]} : vector<2x128xf32> to vector<2x32xf32>
    %135 = vector.extract_strided_slice %131 {offsets = [0, 64], sizes = [2, 32], strides = [1, 1]} : vector<2x128xf32> to vector<2x32xf32>
    %136 = vector.extract_strided_slice %132 {offsets = [0, 96], sizes = [2, 32], strides = [1, 1]} : vector<2x128xf32> to vector<2x32xf32>
    %137 = arith.mulf %134, %120 : vector<2x32xf32>
    %138 = arith.mulf %133, %136 : vector<2x32xf32>
    %139 = arith.addf %137, %138 : vector<2x32xf32>
    %140 = math.tanh %139 : vector<2x32xf32>
    %141 = arith.mulf %135, %140 : vector<2x32xf32>
    %142 = arith.truncf %141 : vector<2x32xf32> to vector<2x32xbf16>
    %cst_23 = arith.constant dense<0.000000e+00> : vector<2x128xf32>
    %143 = tpu.matmul %142, %6, %cst_23 {dimension_numbers = #tpu.dot_dimension_numbers<[1], [0], [0], [1], [0, 0, 1, 1], [], []>} : vector<2x32xbf16>, vector<32x128xbf16>, vector<2x128xf32> -> vector<2x128xf32>
    %144 = vector.extract_strided_slice %5 {offsets = [14, 0], sizes = [2, 128], strides = [1, 1]} : vector<16x128xf32> to vector<2x128xf32>
    %145 = arith.addf %144, %143 : vector<2x128xf32>
    %146 = arith.negf %145 : vector<2x128xf32>
    %147 = math.exp %146 : vector<2x128xf32>
    %cst_24 = arith.constant 1.000000e+00 : f32
    %148 = vector.broadcast %cst_24 : f32 to vector<2x128xf32>
    %149 = arith.addf %148, %147 : vector<2x128xf32>
    %150 = arith.divf %148, %149 : vector<2x128xf32>
    %151 = math.tanh %145 : vector<2x128xf32>
    %152 = vector.extract_strided_slice %150 {offsets = [0, 0], sizes = [2, 32], strides = [1, 1]} : vector<2x128xf32> to vector<2x32xf32>
    %153 = vector.extract_strided_slice %150 {offsets = [0, 32], sizes = [2, 32], strides = [1, 1]} : vector<2x128xf32> to vector<2x32xf32>
    %154 = vector.extract_strided_slice %150 {offsets = [0, 64], sizes = [2, 32], strides = [1, 1]} : vector<2x128xf32> to vector<2x32xf32>
    %155 = vector.extract_strided_slice %151 {offsets = [0, 96], sizes = [2, 32], strides = [1, 1]} : vector<2x128xf32> to vector<2x32xf32>
    %156 = arith.mulf %153, %139 : vector<2x32xf32>
    %157 = arith.mulf %152, %155 : vector<2x32xf32>
    %158 = arith.addf %156, %157 : vector<2x32xf32>
    %159 = math.tanh %158 : vector<2x32xf32>
    %160 = arith.mulf %154, %159 : vector<2x32xf32>
    %161 = arith.truncf %160 : vector<2x32xf32> to vector<2x32xbf16>
    %c0_25 = arith.constant 0 : index
    %c0_26 = arith.constant 0 : index
    %162 = vector.load %arg4[%c0_25, %c0_26] : memref<32x128xbf16, #tpu.memory_space<vmem>>, vector<32x128xbf16>
    %cst_27 = arith.constant dense<0.000000e+00> : vector<2x128xf32>
    %163 = tpu.matmul %161, %162, %cst_27 {dimension_numbers = #tpu.dot_dimension_numbers<[1], [0], [0], [1], [0, 0, 1, 1], [], []>} : vector<2x32xbf16>, vector<32x128xbf16>, vector<2x128xf32> -> vector<2x128xf32>
    %c0_28 = arith.constant 0 : index
    %c0_29 = arith.constant 0 : index
    %164 = vector.load %arg5[%c0_28, %c0_29] : memref<1x128xf32, #tpu.memory_space<vmem>>, vector<1x128xf32>
    %165 = vector.broadcast %164 : vector<1x128xf32> to vector<2x128xf32>
    %166 = arith.addf %163, %165 : vector<2x128xf32>
    %167 = arith.negf %166 : vector<2x128xf32>
    %168 = math.exp %167 : vector<2x128xf32>
    %cst_30 = arith.constant 1.000000e+00 : f32
    %169 = vector.broadcast %cst_30 : f32 to vector<2x128xf32>
    %170 = arith.addf %169, %168 : vector<2x128xf32>
    %171 = arith.divf %169, %170 : vector<2x128xf32>
    %c0_31 = arith.constant 0 : index
    %c0_32 = arith.constant 0 : index
    %172 = vector.load %arg6[%c0_31, %c0_32] : memref<2x128xf32, #tpu.memory_space<vmem>>, vector<2x128xf32>
    tpu.vector_store %arg6[%c0_31, %c0_32], %171 {strides = array<i32>} : memref<2x128xf32, #tpu.memory_space<vmem>>, vector<2x128xf32>,
    return
  }
}

</mosaic_0001>

<bundles_post_ra>
// kernel: tpu_custom_call.1
= control target key start
LH: loop header
LB: loop body
LE: loop exit
PB: predicated region body
PF: predicated region fallthrough
CT: control target
= control target key end

     0   :  { %11 = vsyncpa [#allocation3], 0  ;;  %s1460_s0 = inlined_call_operand.hbm [shape: bf16[16,16], index: 0, kind: input, shape index: {}]   ;;  %s1461_s1 = inlined_call_operand.hbm [shape: bf16[16,128], index: 1, kind: input, shape index: {}]   ;;  %s1462_s2 = inlined_call_operand.hbm [shape: bf16[32,128], index: 2, kind: input, shape index: {}]   ;;  %s1463_s3 = inlined_call_operand.vmem [shape: f32[1,128], index: 3, kind: input, shape index: {}]   ;;  %s1464_s4 = inlined_call_operand.hbm [shape: bf16[32,128], index: 4, kind: input, shape index: {}]   ;;  %s1465_s5 = inlined_call_operand.vmem [shape: f32[1,128], index: 5, kind: input, shape index: {}]   ;;  %s1466_s6 = inlined_call_operand.hbm [shape: f32[2,128], index: 6, kind: output, shape index: {}]  }
   0x1   :  { %12 = vsyncpa [#allocation6], 0 }
   0x2   :  { %13 = vsyncpa [#allocation9], 0 }
   0x3   :  { %14 = vsyncpa [#allocation4], 0  ;;  %s1211_s21 = smov [#allocation5]   ;;  %s1212_s23 = smov [#allocation2]  }
   0x4   :  { %s32_s22 = sshll.u32 %s1211_s21, 4  ;;  %s20_s24 = sshll.u32 %s1212_s23, 4  ;;  %s33_s22 = int_to_ptr.vmem [resolvable:$true] %s32_s22  ;;  %s1257_s24 = int_to_ptr.vmem [resolvable:$true] %s20_s24 }
   0x5   :  { %s1093_s27 = scalar_lea.hbm %s1461_s1, 128 }
   0x6   :  { %p1094_p0 = scmp.ne.s32.totalorder %s1461_s1, %s1093_s27  ;;  %p1097_p1 = scmp.lt.u32.totalorder %s1093_s27, %s1461_s1 }
   0x8   :  { %p1099_p2 = pnand %p1097_p1, %p1094_p0 }
   0xa   :  { %1102 = shalt.err (!%p1099_p2)
}
   0xb   :  { %s1103_s8 = scalar_lea.vmem %s33_s22, 128  ;;  %p1108_p4 = scmp.lt.s32.totalorder %s33_s22, %s33_s22 }
   0xc   :  { %p1104_p3 = scmp.ne.s32.totalorder %s33_s22, %s1103_s8  ;;  %p1109_p5 = scmp.lt.s32.totalorder %s1103_s8, %s1103_s8 }
   0xe   :  { %p1110_p6 = por %p1109_p5, %p1108_p4 }
  0x10   :  { %p1111_p7 = pnand %p1110_p6, %p1104_p3 }
  0x12   :  { %1114 = shalt.err (!%p1111_p7)
}
  0x13   :  { %s1213_s9 = smov 64   ;;  %s1214_s10 = smov 4  }
  0x14   :  { %38 = dma.hbm_to_vmem [thread:$0]  %s1461_s1, 128, %s33_s22, [#allocation6], %s1213_s9, %s1213_s9, %s1214_s10  }
  0x15   :  { %s1115_s15 = scalar_lea.hbm %s1460_s0, 128 }
  0x16   :  { %p1116_p8 = scmp.ne.s32.totalorder %s1460_s0, %s1115_s15  ;;  %p1119_p9 = scmp.lt.u32.totalorder %s1115_s15, %s1460_s0 }
  0x18   :  { %p1121_p10 = pnand %p1119_p9, %p1116_p8 }
  0x1a   :  { %1124 = shalt.err (!%p1121_p10)
}
  0x1b   :  { %s1125_s20 = scalar_lea.vmem %s1257_s24, 128  ;;  %p1130_p12 = scmp.lt.s32.totalorder %s1257_s24, %s1257_s24 }
  0x1c   :  { %p1126_p11 = scmp.ne.s32.totalorder %s1257_s24, %s1125_s20  ;;  %p1131_p13 = scmp.lt.s32.totalorder %s1125_s20, %s1125_s20 }
  0x1e   :  { %p1132_p0 = por %p1131_p13, %p1130_p12 }
  0x20   :  { %p1133_p1 = pnand %p1132_p0, %p1126_p11 }
  0x22   :  { %1136 = shalt.err (!%p1133_p1)
}
  0x23   :  { %26 = dma.hbm_to_vmem [thread:$0]  %s1460_s0, 128, %s1257_s24, [#allocation3], %s1213_s9, %s1213_s9, %s1214_s10  }
  0x24   :  { %s1215_s22 = smov [#allocation7]   ;;  %s1216_s25 = smov [#allocation8]  }
  0x25   :  { %s44_s23 = sshll.u32 %s1215_s22, 4  ;;  %s58_s26 = sshll.u32 %s1216_s25, 4  ;;  %s45_s23 = int_to_ptr.vmem [resolvable:$true] %s44_s23  ;;  %s1294_s26 = int_to_ptr.vmem [resolvable:$true] %s58_s26 }
  0x26   :  { %s1137_s29 = scalar_lea.hbm %s1462_s2, 256 }
  0x27   :  { %p1138_p2 = scmp.ne.s32.totalorder %s1462_s2, %s1137_s29  ;;  %p1141_p3 = scmp.lt.u32.totalorder %s1137_s29, %s1462_s2 }
  0x29   :  { %p1143_p4 = pnand %p1141_p3, %p1138_p2 }
  0x2b   :  { %1146 = shalt.err (!%p1143_p4)
}
  0x2c   :  { %s1147_s0 = scalar_lea.vmem %s45_s23, 256  ;;  %p1152_p6 = scmp.lt.s32.totalorder %s45_s23, %s45_s23 }
  0x2d   :  { %p1148_p5 = scmp.ne.s32.totalorder %s45_s23, %s1147_s0  ;;  %p1153_p7 = scmp.lt.s32.totalorder %s1147_s0, %s1147_s0 }
  0x2f   :  { %p1154_p8 = por %p1153_p7, %p1152_p6 }
  0x31   :  { %p1155_p9 = pnand %p1154_p8, %p1148_p5 }
  0x33   :  { %1158 = shalt.err (!%p1155_p9)
}
  0x34   :  { %50 = dma.hbm_to_vmem [thread:$0]  %s1462_s2, 256, %s45_s23, [#allocation6], %s1213_s9, %s1213_s9, %s1214_s10  }
  0x35   :  { %s1159_s15 = scalar_lea.hbm %s1464_s4, 256 }
  0x36   :  { %p1160_p10 = scmp.ne.s32.totalorder %s1464_s4, %s1159_s15  ;;  %p1163_p11 = scmp.lt.u32.totalorder %s1159_s15, %s1464_s4 }
  0x38   :  { %p1165_p12 = pnand %p1163_p11, %p1160_p10 }
  0x3a   :  { %1168 = shalt.err (!%p1165_p12)
}
  0x3b   :  { %s1169_s20 = scalar_lea.vmem %s1294_s26, 256  ;;  %p1174_p0 = scmp.lt.s32.totalorder %s1294_s26, %s1294_s26 }
  0x3c   :  { %p1170_p13 = scmp.ne.s32.totalorder %s1294_s26, %s1169_s20  ;;  %p1175_p1 = scmp.lt.s32.totalorder %s1169_s20, %s1169_s20 }
  0x3e   :  { %p1176_p2 = por %p1175_p1, %p1174_p0 }
  0x40   :  { %p1177_p3 = pnand %p1176_p2, %p1170_p13 }
  0x42   :  { %1180 = shalt.err (!%p1177_p3)
}
  0x43   :  { %64 = dma.hbm_to_vmem [thread:$0]  %s1464_s4, 256, %s1294_s26, [#allocation9], %s1213_s9, %s1213_s9, %s1214_s10  }
  0x44   :  { %1203 = dma.done.wait [#allocation3], 128  }
  0x45   :  { %1204 = vsyncadd [#allocation3], 4294967168 }
  0x46   :  { %1205 = dma.done.wait [#allocation6], 384  }
  0x47   :  { %1206 = vsyncadd [#allocation6], 4294966912 }
  0x48   :  { %1207 = dma.done.wait [#allocation9], 256  }
  0x49   :  { %1208 = vsyncadd [#allocation9], 4294967040  ;;  %v1217_v0 = vmov 0.0   ;;  %vm1218_vm0 = vmmov 0   ;;  %v1019_v1 = vld [vmem:[#allocation5] sm:$0xff]   ;;  %v1337_v2 = vld [vmem:[#allocation7] sm:$0xff]  }
  0x4a   :  { %930 = vmatprep.subr.bf16.mxu0 %v1217_v0  ;;  %936 = vmatprep.subr.bf16.mxu1 %v1217_v0  ;;  %v1021_v3 = vld [vmem:[#allocation2] sm:$0xff]   ;;  %vm102_vm1 = vcmask 130048   ;;  %v1340_v4 = vld [vmem:[#allocation7 + $0x8] sm:$0xff]   ;;  %v1219_v5 = vmov 0   ;;  %s1220_s21 = smov 32   ;;  %vm163_vm2 = vcmask 261120  }
  0x4b   :  { %932 = vmatprep.mubr.msk.bf16.mxu0 %vm1218_vm0, %v1217_v0  ;;  %940 = vmatprep.mubr.msk.bf16.mxu1 %vm1218_vm0, %v1217_v0  ;;  %v875_v6 = vld [vmem:[%s1463_s3] ss:$0 sm:$0xff]  ;;  %s1221_s23 = smov [#allocation10]  }
  0x4c   :  { %931 = vmatpush3.bf16.msra.mxu0 %v1019_v1  ;;  %937 = vmatpush3.bf16.msra.mxu1 %v1337_v2  ;;  %s864_s25 = sshll.u32 %s1221_s23, 4  ;;  %s865_s25 = int_to_ptr.vmem [resolvable:$true] %s864_s25 }
  0x4d   :  { %944 = vmatprep.subr.bf16.mxu0 %v1217_v0  ;;  %938 = vmatprep.subr.bf16.mxu1 %v1217_v0  ;;  %p1186_p5 = scmp.lt.s32.totalorder %s865_s25, %s865_s25 }
  0x4f   :  { %933 = vmatmul.mubr.msk.bf16.vlgmr.msra.gmra.mrb[0].mxu0 %vm102_vm1, %v1021_v3 }
  0x50   :  { %945 = vmatpush3.bf16.msra.mxu0 %v1337_v2  ;;  %948 = vmatprep.mubr.msk.bf16.mxu0 %vm1218_vm0, %v1217_v0 }
  0x51   :  { %939 = vmatpush3.bf16.msra.mxu1 %v1340_v4  ;;  %946 = vmatprep.subr.bf16.mxu0 %v1217_v0 }
  0x52   :  { %952 = vmatprep.subr.bf16.mxu1 %v1217_v0 }
  0x54   :  { %941 = vmatmul.mubr.bf16.vlgmr.msra.gmra.mrb[0].mxu1 %v1219_v5  ;;  %947 = vmatpush3.bf16.msra.mxu0 %v1340_v4 }
  0x55   :  { %953 = vmatpush3.bf16.msra.mxu1 %v1337_v2  ;;  %956 = vmatprep.mubr.msk.bf16.mxu1 %vm1218_vm0, %v1217_v0 }
  0x56   :  { %954 = vmatprep.subr.bf16.mxu1 %v1217_v0  ;;  %960 = vmatprep.subr.bf16.mxu0 %v1217_v0 }
  0x59   :  { %955 = vmatpush3.bf16.msra.mxu1 %v1340_v4 }
  0x5a   :  { %968 = vmatprep.subr.bf16.mxu1 %v1217_v0 }
 0x122   :  { %v140_v7 = vpop.f32.mrb[0].mxu0 }
 0x123   :  { %v934_v8 = vpop.f32.mrb[1].mxu0  ;;  %v1361_v9 = vadd.f32 %v875_v6, %v140_v7 }
 0x124   :  { %v143_v10 = vpop.f32.mrb[2].mxu0 }
 0x125   :  { %v1363_v11 = vadd.f32 %v875_v6, %v143_v10  ;;  %v935_v12 = vpop.f32.mrb[3].mxu0 }
 0x127   :  { %v201_v13 = vpop.f32.mrb[0].mxu1 }
 0x128   :  { %v207_v14 = vadd.f32 %v201_v13, %v1361_v9  ;;  %v942_v15 = vpop.f32.mrb[1].mxu1 }
 0x129   :  { %v204_v16 = vpop.f32.mrb[2].mxu1 }
 0x12a   :  { %1025 = vtanh.f32 %v207_v14  ;;  %v943_v17 = vpop.f32.mrb[3].mxu1  ;;  %v881_v19 = vmul.f32 -1.442695, %v207_v14 }
 0x12c   :  { %1027 = vpow2.f32 %v881_v19 }
 0x134   :  { %v1026_v18 = vpop.eup %1025 }
 0x135   :  { %217 = vrot.lane.b32.xlu0 %v1026_v18, %s1220_s21 }
 0x136   :  { %v1028_v20 = vpop.eup %1027 }
 0x137   :  { %v211_v21 = vadd.f32 1.0, %v1028_v20 }
 0x139   :  { %1029 = vrcp.f32 %v211_v21 }
 0x143   :  { %v1030_v22 = vpop.eup %1029 }
 0x144   :  { %v215_v25 = vmul.f32 0.0, %v1030_v22 }
 0x1a7   :  { %v218_v23 = vpop.permute.xlu0 %217 }
 0x1a8   :  { %v220_v24 = vmul.f32 %v1030_v22, %v218_v23 }
 0x1aa   :  { %222 = vrot.lane.b32.xlu0 %v220_v24, %s1220_s21 }
 0x21c   :  { %v223_v26 = vpop.permute.xlu0 %222 }
 0x21d   :  { %v225_v27 = vadd.f32 %v223_v26, %v215_v25 }
 0x21f   :  { %1031 = vtanh.f32 %v225_v27  ;;  %v291_v46 = vrot.slane %v225_v27, 6 }
 0x229   :  { %v1032_v28 = vpop.eup %1031 }
 0x22a   :  { %228 = vrot.lane.b32.xlu1 %v1032_v28, %s1220_s21 }
 0x29c   :  { %v229_v29 = vpop.permute.xlu1 %228 }
 0x29d   :  { %v231_v30 = vmul.f32 %v1030_v22, %v229_v29 }
 0x29f   :  { %v232_v31 = vpack.c.bf16 %v231_v30, %v231_v30 }
 0x2a1   :  { %234 = vrot.lane.b32.xlu1 %v232_v31, %s1213_s9 }
 0x313   :  { %v235_v32 = vpop.permute.xlu1 %234 }
 0x314   :  { %949 = vmatmul.mubr.msk.bf16.vlgmr.msra.gmra.mrb[4].mxu0 %vm163_vm2, %v235_v32 }
 0x315   :  { %961 = vmatpush3.bf16.msra.mxu0 %v1337_v2  ;;  %964 = vmatprep.mubr.msk.bf16.mxu0 %vm1218_vm0, %v1217_v0 }
 0x316   :  { %962 = vmatprep.subr.bf16.mxu0 %v1217_v0 }
 0x319   :  { %963 = vmatpush3.bf16.msra.mxu0 %v1340_v4 }
 0x31a   :  { %976 = vmatprep.subr.bf16.mxu0 %v1217_v0 }
 0x3e7   :  { %v273_v33 = vpop.f32.mrb[4].mxu0 }
 0x3e8   :  { %v280_v34 = vrot.slane %v273_v33, 6  ;;  %v950_v35 = vpop.f32.mrb[5].mxu0 }
 0x3e9   :  { %v276_v36 = vpop.f32.mrb[6].mxu0 }
 0x3ea   :  { %v282_v37 = vadd.f32 %v280_v34, %v1361_v9  ;;  %v951_v38 = vpop.f32.mrb[7].mxu0 }
 0x3ec   :  { %1033 = vtanh.f32 %v282_v37  ;;  %v883_v40 = vmul.f32 -1.442695, %v282_v37 }
 0x3ee   :  { %1035 = vpow2.f32 %v883_v40 }
 0x3f6   :  { %v1034_v39 = vpop.eup %1033 }
 0x3f7   :  { %295 = vrot.lane.b32.xlu0 %v1034_v39, %s1220_s21 }
 0x3f8   :  { %v1036_v41 = vpop.eup %1035 }
 0x3f9   :  { %v286_v42 = vadd.f32 1.0, %v1036_v41 }
 0x3fb   :  { %1037 = vrcp.f32 %v286_v42 }
 0x405   :  { %v1038_v43 = vpop.eup %1037 }
 0x406   :  { %v293_v47 = vmul.f32 %v1038_v43, %v291_v46 }
 0x469   :  { %v296_v44 = vpop.permute.xlu0 %295 }
 0x46a   :  { %v298_v45 = vmul.f32 %v1038_v43, %v296_v44 }
 0x46c   :  { %300 = vrot.lane.b32.xlu1 %v298_v45, %s1220_s21 }
 0x4de   :  { %v301_v48 = vpop.permute.xlu1 %300 }
 0x4df   :  { %v303_v49 = vadd.f32 %v301_v48, %v293_v47 }
 0x4e1   :  { %1039 = vtanh.f32 %v303_v49  ;;  %v370_v8 = vrot.slane %v303_v49, 6 }
 0x4eb   :  { %v1040_v50 = vpop.eup %1039 }
 0x4ec   :  { %306 = vrot.lane.b32.xlu0 %v1040_v50, %s1220_s21 }
 0x55e   :  { %v307_v51 = vpop.permute.xlu0 %306 }
 0x55f   :  { %v309_v52 = vmul.f32 %v1038_v43, %v307_v51 }
 0x561   :  { %v310_v53 = vpack.c.bf16 %v309_v52, %v309_v52 }
 0x563   :  { %v312_v54 = vrot.slane %v310_v53, 1 }
 0x565   :  { %313 = vrot.lane.b32.xlu1 %v312_v54, %s1213_s9 }
 0x5d7   :  { %v314_v55 = vpop.permute.xlu1 %313 }
 0x5d8   :  { %957 = vmatmul.mubr.msk.bf16.vlgmr.msra.gmra.mrb[4].mxu1 %vm163_vm2, %v314_v55 }
 0x5d9   :  { %969 = vmatpush3.bf16.msra.mxu1 %v1337_v2  ;;  %972 = vmatprep.mubr.msk.bf16.mxu1 %vm1218_vm0, %v1217_v0 }
 0x5da   :  { %970 = vmatprep.subr.bf16.mxu1 %v1217_v0 }
 0x5dd   :  { %971 = vmatpush3.bf16.msra.mxu1 %v1340_v4 }
 0x5de   :  { %984 = vmatprep.subr.bf16.mxu1 %v1217_v0 }
 0x6ab   :  { %v352_v56 = vpop.f32.mrb[4].mxu1 }
 0x6ac   :  { %v359_v57 = vrot.slane %v352_v56, 4  ;;  %v958_v58 = vpop.f32.mrb[5].mxu1 }
 0x6ad   :  { %v355_v59 = vpop.f32.mrb[6].mxu1 }
 0x6ae   :  { %v361_v60 = vadd.f32 %v359_v57, %v1361_v9  ;;  %v959_v61 = vpop.f32.mrb[7].mxu1 }
 0x6b0   :  { %1041 = vtanh.f32 %v361_v60  ;;  %v885_v63 = vmul.f32 -1.442695, %v361_v60 }
 0x6b2   :  { %1043 = vpow2.f32 %v885_v63 }
 0x6ba   :  { %v1042_v62 = vpop.eup %1041 }
 0x6bb   :  { %374 = vrot.lane.b32.xlu0 %v1042_v62, %s1220_s21 }
 0x6bc   :  { %v1044_v1 = vpop.eup %1043 }
 0x6bd   :  { %v365_v3 = vadd.f32 1.0, %v1044_v1 }
 0x6bf   :  { %1045 = vrcp.f32 %v365_v3 }
 0x6c9   :  { %v1046_v5 = vpop.eup %1045 }
 0x6ca   :  { %v372_v10 = vmul.f32 %v1046_v5, %v370_v8 }
 0x72d   :  { %v375_v6 = vpop.permute.xlu0 %374 }
 0x72e   :  { %v377_v7 = vmul.f32 %v1046_v5, %v375_v6 }
 0x730   :  { %379 = vrot.lane.b32.xlu1 %v377_v7, %s1220_s21 }
 0x7a2   :  { %v380_v12 = vpop.permute.xlu1 %379 }
 0x7a3   :  { %v382_v13 = vadd.f32 %v380_v12, %v372_v10 }
 0x7a5   :  { %1047 = vtanh.f32 %v382_v13  ;;  %v449_v33 = vrot.slane %v382_v13, 6 }
 0x7af   :  { %v1048_v14 = vpop.eup %1047 }
 0x7b0   :  { %385 = vrot.lane.b32.xlu0 %v1048_v14, %s1220_s21 }
 0x822   :  { %v386_v15 = vpop.permute.xlu0 %385 }
 0x823   :  { %v388_v16 = vmul.f32 %v1046_v5, %v386_v15 }
 0x825   :  { %v389_v17 = vpack.c.bf16 %v388_v16, %v388_v16 }
 0x827   :  { %v391_v18 = vrot.slane %v389_v17, 2 }
 0x829   :  { %392 = vrot.lane.b32.xlu1 %v391_v18, %s1213_s9 }
 0x89b   :  { %v393_v19 = vpop.permute.xlu1 %392 }
 0x89c   :  { %965 = vmatmul.mubr.msk.bf16.vlgmr.msra.gmra.mrb[8].mxu0 %vm163_vm2, %v393_v19 }
 0x89d   :  { %977 = vmatpush3.bf16.msra.mxu0 %v1337_v2  ;;  %980 = vmatprep.mubr.msk.bf16.mxu0 %vm1218_vm0, %v1217_v0 }
 0x89e   :  { %978 = vmatprep.subr.bf16.mxu0 %v1217_v0 }
 0x8a1   :  { %979 = vmatpush3.bf16.msra.mxu0 %v1340_v4 }
 0x8a2   :  { %992 = vmatprep.subr.bf16.mxu0 %v1217_v0 }
 0x96f   :  { %v431_v20 = vpop.f32.mrb[8].mxu0 }
 0x970   :  { %v438_v21 = vrot.slane %v431_v20, 2  ;;  %v966_v22 = vpop.f32.mrb[9].mxu0 }
 0x971   :  { %v434_v23 = vpop.f32.mrb[10].mxu0 }
 0x972   :  { %v440_v24 = vadd.f32 %v438_v21, %v1361_v9  ;;  %v967_v25 = vpop.f32.mrb[11].mxu0 }
 0x974   :  { %1049 = vtanh.f32 %v440_v24  ;;  %v887_v27 = vmul.f32 -1.442695, %v440_v24 }
 0x976   :  { %1051 = vpow2.f32 %v887_v27 }
 0x97e   :  { %v1050_v26 = vpop.eup %1049 }
 0x97f   :  { %453 = vrot.lane.b32.xlu0 %v1050_v26, %s1220_s21 }
 0x980   :  { %v1052_v28 = vpop.eup %1051 }
 0x981   :  { %v444_v29 = vadd.f32 1.0, %v1052_v28 }
 0x983   :  { %1053 = vrcp.f32 %v444_v29 }
 0x98d   :  { %v1054_v30 = vpop.eup %1053 }
 0x98e   :  { %v451_v34 = vmul.f32 %v1054_v30, %v449_v33 }
 0x9f1   :  { %v454_v31 = vpop.permute.xlu0 %453 }
 0x9f2   :  { %v456_v32 = vmul.f32 %v1054_v30, %v454_v31 }
 0x9f4   :  { %458 = vrot.lane.b32.xlu1 %v456_v32, %s1220_s21 }
 0xa66   :  { %v459_v35 = vpop.permute.xlu1 %458 }
 0xa67   :  { %v461_v36 = vadd.f32 %v459_v35, %v451_v34 }
 0xa69   :  { %1055 = vtanh.f32 %v461_v36  ;;  %v525_v54 = vrot.slane %v461_v36, 6 }
 0xa73   :  { %v1056_v9 = vpop.eup %1055 }
 0xa74   :  { %464 = vrot.lane.b32.xlu0 %v1056_v9, %s1220_s21 }
 0xae6   :  { %v465_v37 = vpop.permute.xlu0 %464 }
 0xae7   :  { %v467_v38 = vmul.f32 %v1054_v30, %v465_v37 }
 0xae9   :  { %v468_v39 = vpack.c.bf16 %v467_v38, %v467_v38 }
 0xaeb   :  { %v470_v40 = vrot.slane %v468_v39, 3 }
 0xaed   :  { %471 = vrot.lane.b32.xlu1 %v470_v40, %s1213_s9 }
 0xb5f   :  { %v472_v41 = vpop.permute.xlu1 %471 }
 0xb60   :  { %973 = vmatmul.mubr.msk.bf16.vlgmr.msra.gmra.mrb[8].mxu1 %vm163_vm2, %v472_v41 }
 0xb61   :  { %985 = vmatpush3.bf16.msra.mxu1 %v1337_v2  ;;  %988 = vmatprep.mubr.msk.bf16.mxu1 %vm1218_vm0, %v1217_v0 }
 0xb62   :  { %986 = vmatprep.subr.bf16.mxu1 %v1217_v0 }
 0xb65   :  { %987 = vmatpush3.bf16.msra.mxu1 %v1340_v4 }
 0xb66   :  { %1000 = vmatprep.subr.bf16.mxu1 %v1217_v0 }
 0xc33   :  { %v510_v42 = vpop.f32.mrb[8].mxu1 }
 0xc34   :  { %v516_v43 = vadd.f32 %v510_v42, %v1363_v11  ;;  %v974_v44 = vpop.f32.mrb[9].mxu1 }
 0xc35   :  { %v513_v45 = vpop.f32.mrb[10].mxu1 }
 0xc36   :  { %1057 = vtanh.f32 %v516_v43  ;;  %v975_v46 = vpop.f32.mrb[11].mxu1  ;;  %v889_v48 = vmul.f32 -1.442695, %v516_v43 }
 0xc38   :  { %1059 = vpow2.f32 %v889_v48 }
 0xc40   :  { %v1058_v47 = vpop.eup %1057 }
 0xc41   :  { %529 = vrot.lane.b32.xlu0 %v1058_v47, %s1220_s21 }
 0xc42   :  { %v1060_v49 = vpop.eup %1059 }
 0xc43   :  { %v520_v50 = vadd.f32 1.0, %v1060_v49 }
 0xc45   :  { %1061 = vrcp.f32 %v520_v50 }
 0xc4f   :  { %v1062_v51 = vpop.eup %1061 }
 0xc50   :  { %v527_v55 = vmul.f32 %v1062_v51, %v525_v54 }
 0xcb3   :  { %v530_v52 = vpop.permute.xlu0 %529 }
 0xcb4   :  { %v532_v53 = vmul.f32 %v1062_v51, %v530_v52 }
 0xcb6   :  { %534 = vrot.lane.b32.xlu1 %v532_v53, %s1220_s21 }
 0xd28   :  { %v535_v56 = vpop.permute.xlu1 %534 }
 0xd29   :  { %v537_v57 = vadd.f32 %v535_v56, %v527_v55 }
 0xd2b   :  { %1063 = vtanh.f32 %v537_v57 }
 0xd35   :  { %v1064_v58 = vpop.eup %1063 }
 0xd36   :  { %540 = vrot.lane.b32.xlu0 %v1064_v58, %s1220_s21 }
 0xda8   :  { %v541_v59 = vpop.permute.xlu0 %540 }
 0xda9   :  { %v543_v60 = vmul.f32 %v1062_v51, %v541_v59 }
 0xdab   :  { %v544_v61 = vpack.c.bf16 %v543_v60, %v543_v60 }
 0xdad   :  { %546 = vrot.lane.b32.xlu1 %v544_v61, %s1213_s9 }
 0xe1f   :  { %v547_v62 = vpop.permute.xlu1 %546 }
 0xe20   :  { %981 = vmatmul.mubr.msk.bf16.vlgmr.msra.gmra.mrb[12].mxu0 %vm163_vm2, %v547_v62 }
 0xe21   :  { %993 = vmatpush3.bf16.msra.mxu0 %v1337_v2  ;;  %996 = vmatprep.mubr.msk.bf16.mxu0 %vm1218_vm0, %v1217_v0 }
 0xe22   :  { %994 = vmatprep.subr.bf16.mxu0 %v1217_v0 }
 0xe25   :  { %995 = vmatpush3.bf16.msra.mxu0 %v1340_v4  ;;  %v603_v4 = vrot.slane %v537_v57, 6 }
 0xef3   :  { %v585_v63 = vpop.f32.mrb[12].mxu0 }
 0xef4   :  { %v592_v1 = vrot.slane %v585_v63, 6  ;;  %v982_v3 = vpop.f32.mrb[13].mxu0 }
 0xef5   :  { %v588_v5 = vpop.f32.mrb[14].mxu0 }
 0xef6   :  { %v594_v6 = vadd.f32 %v592_v1, %v1363_v11  ;;  %v983_v7 = vpop.f32.mrb[15].mxu0  ;;  %v1024_v1 = vld [vmem:[#allocation8 + $0x8] sm:$0xff]  }
 0xef8   :  { %1065 = vtanh.f32 %v594_v6  ;;  %v891_v10 = vmul.f32 -1.442695, %v594_v6 }
 0xefa   :  { %1067 = vpow2.f32 %v891_v10 }
 0xf02   :  { %v1066_v8 = vpop.eup %1065 }
 0xf03   :  { %607 = vrot.lane.b32.xlu0 %v1066_v8, %s1220_s21 }
 0xf04   :  { %v1068_v2 = vpop.eup %1067 }
 0xf05   :  { %v598_v12 = vadd.f32 1.0, %v1068_v2  ;;  %v896_v2 = vld [vmem:[%s1465_s5] ss:$0 sm:$0xff] }
 0xf07   :  { %1069 = vrcp.f32 %v598_v12 }
 0xf11   :  { %v1070_v13 = vpop.eup %1069 }
 0xf12   :  { %v605_v16 = vmul.f32 %v1070_v13, %v603_v4 }
 0xf75   :  { %v608_v14 = vpop.permute.xlu0 %607 }
 0xf76   :  { %v610_v15 = vmul.f32 %v1070_v13, %v608_v14 }
 0xf78   :  { %612 = vrot.lane.b32.xlu1 %v610_v15, %s1220_s21 }
 0xfea   :  { %v613_v17 = vpop.permute.xlu1 %612 }
 0xfeb   :  { %v615_v18 = vadd.f32 %v613_v17, %v605_v16 }
 0xfed   :  { %1071 = vtanh.f32 %v615_v18  ;;  %v682_v37 = vrot.slane %v615_v18, 6 }
 0xff7   :  { %v1072_v19 = vpop.eup %1071 }
 0xff8   :  { %618 = vrot.lane.b32.xlu0 %v1072_v19, %s1220_s21 }
0x106a   :  { %v619_v20 = vpop.permute.xlu0 %618 }
0x106b   :  { %v621_v21 = vmul.f32 %v1070_v13, %v619_v20 }
0x106d   :  { %v622_v22 = vpack.c.bf16 %v621_v21, %v621_v21 }
0x106f   :  { %v624_v23 = vrot.slane %v622_v22, 1 }
0x1071   :  { %625 = vrot.lane.b32.xlu1 %v624_v23, %s1213_s9 }
0x10e3   :  { %v626_v24 = vpop.permute.xlu1 %625 }
0x10e4   :  { %989 = vmatmul.mubr.msk.bf16.vlgmr.msra.gmra.mrb[12].mxu1 %vm163_vm2, %v626_v24 }
0x10e5   :  { %1004 = vmatprep.mubr.msk.bf16.mxu1 %vm1218_vm0, %v1217_v0 }
0x11b7   :  { %v664_v25 = vpop.f32.mrb[12].mxu1 }
0x11b8   :  { %v671_v26 = vrot.slane %v664_v25, 4  ;;  %v990_v27 = vpop.f32.mrb[13].mxu1 }
0x11b9   :  { %v667_v28 = vpop.f32.mrb[14].mxu1 }
0x11ba   :  { %v673_v29 = vadd.f32 %v671_v26, %v1363_v11  ;;  %v991_v30 = vpop.f32.mrb[15].mxu1 }
0x11bc   :  { %1073 = vtanh.f32 %v673_v29  ;;  %v893_v32 = vmul.f32 -1.442695, %v673_v29 }
0x11be   :  { %1075 = vpow2.f32 %v893_v32 }
0x11c6   :  { %v1074_v31 = vpop.eup %1073 }
0x11c7   :  { %686 = vrot.lane.b32.xlu0 %v1074_v31, %s1220_s21 }
0x11c8   :  { %v1076_v33 = vpop.eup %1075 }
0x11c9   :  { %v677_v34 = vadd.f32 1.0, %v1076_v33 }
0x11cb   :  { %1077 = vrcp.f32 %v677_v34 }
0x11d5   :  { %v1078_v35 = vpop.eup %1077 }
0x11d6   :  { %v684_v38 = vmul.f32 %v1078_v35, %v682_v37 }
0x1239   :  { %v687_v36 = vpop.permute.xlu0 %686 }
0x123a   :  { %v689_v9 = vmul.f32 %v1078_v35, %v687_v36 }
0x123c   :  { %691 = vrot.lane.b32.xlu1 %v689_v9, %s1220_s21 }
0x12ae   :  { %v692_v39 = vpop.permute.xlu1 %691 }
0x12af   :  { %v694_v40 = vadd.f32 %v692_v39, %v684_v38 }
0x12b1   :  { %1079 = vtanh.f32 %v694_v40  ;;  %v761_v60 = vrot.slane %v694_v40, 6 }
0x12bb   :  { %v1080_v41 = vpop.eup %1079 }
0x12bc   :  { %697 = vrot.lane.b32.xlu0 %v1080_v41, %s1220_s21 }
0x132e   :  { %v698_v42 = vpop.permute.xlu0 %697 }
0x132f   :  { %v700_v43 = vmul.f32 %v1078_v35, %v698_v42 }
0x1331   :  { %v701_v44 = vpack.c.bf16 %v700_v43, %v700_v43 }
0x1333   :  { %v703_v45 = vrot.slane %v701_v44, 2 }
0x1335   :  { %704 = vrot.lane.b32.xlu1 %v703_v45, %s1213_s9 }
0x13a7   :  { %v705_v46 = vpop.permute.xlu1 %704 }
0x13a8   :  { %997 = vmatmul.mubr.msk.bf16.vlgmr.msra.gmra.mrb[16].mxu0 %vm163_vm2, %v705_v46 }
0x147b   :  { %v743_v47 = vpop.f32.mrb[16].mxu0 }
0x147c   :  { %v750_v48 = vrot.slane %v743_v47, 2  ;;  %v998_v49 = vpop.f32.mrb[17].mxu0 }
0x147d   :  { %v746_v50 = vpop.f32.mrb[18].mxu0 }
0x147e   :  { %v752_v51 = vadd.f32 %v750_v48, %v1363_v11  ;;  %v999_v52 = vpop.f32.mrb[19].mxu0  ;;  %v1023_v11 = vld [vmem:[#allocation8] sm:$0xff]  }
0x147f   :  { %1001 = vmatpush3.bf16.msra.mxu1 %v1023_v11 }
0x1480   :  { %1081 = vtanh.f32 %v752_v51  ;;  %v895_v54 = vmul.f32 -1.442695, %v752_v51  ;;  %1002 = vmatprep.subr.bf16.mxu1 %v1217_v0 }
0x1482   :  { %1083 = vpow2.f32 %v895_v54 }
0x1483   :  { %1003 = vmatpush3.bf16.msra.mxu1 %v1024_v1 }
0x148a   :  { %v1082_v53 = vpop.eup %1081 }
0x148b   :  { %765 = vrot.lane.b32.xlu0 %v1082_v53, %s1220_s21 }
0x148c   :  { %v1084_v55 = vpop.eup %1083 }
0x148d   :  { %v756_v56 = vadd.f32 1.0, %v1084_v55 }
0x148f   :  { %1085 = vrcp.f32 %v756_v56 }
0x1499   :  { %v1086_v57 = vpop.eup %1085 }
0x149a   :  { %v763_v61 = vmul.f32 %v1086_v57, %v761_v60 }
0x14fd   :  { %v766_v58 = vpop.permute.xlu0 %765 }
0x14fe   :  { %v768_v59 = vmul.f32 %v1086_v57, %v766_v58 }
0x1500   :  { %770 = vrot.lane.b32.xlu1 %v768_v59, %s1220_s21 }
0x1572   :  { %v771_v62 = vpop.permute.xlu1 %770 }
0x1573   :  { %v773_v63 = vadd.f32 %v771_v62, %v763_v61 }
0x1575   :  { %1087 = vtanh.f32 %v773_v63 }
0x157f   :  { %v1088_v3 = vpop.eup %1087 }
0x1580   :  { %776 = vrot.lane.b32.xlu0 %v1088_v3, %s1220_s21 }
0x15f2   :  { %v777_v5 = vpop.permute.xlu0 %776 }
0x15f3   :  { %v779_v6 = vmul.f32 %v1086_v57, %v777_v5 }
0x15f5   :  { %v780_v7 = vpack.c.bf16 %v779_v6, %v779_v6 }
0x15f7   :  { %v793_v8 = vrot.slane %v780_v7, 3 }
0x15f9   :  { %794 = vrot.lane.b32.xlu1 %v793_v8, %s1213_s9  ;;  %s1181_s9 = scalar_lea.vmem %s865_s25, 32 }
0x15fa   :  { %p1182_p4 = scmp.ne.s32.totalorder %s865_s25, %s1181_s9  ;;  %p1187_p6 = scmp.lt.s32.totalorder %s1181_s9, %s1181_s9 }
0x15fc   :  { %p1188_p7 = por %p1187_p6, %p1186_p5 }
0x15fe   :  { %p1189_p8 = pnand %p1188_p7, %p1182_p4 }
0x166b   :  { %v795_v10 = vpop.permute.xlu1 %794 }
0x166c   :  { %1005 = vmatmul.mubr.msk.bf16.vlgmr.msra.gmra.mrb[16].mxu1 %vm163_vm2, %v795_v10 }
0x173f   :  { %v845_v12 = vpop.f32.mrb[16].mxu1 }
0x1740   :  { %v846_v13 = vadd.f32 %v896_v2, %v845_v12  ;;  %v1006_v0 = vpop.f32.mrb[17].mxu1 }
0x1741   :  { %v848_v14 = vpop.f32.mrb[18].mxu1 }
0x1742   :  { %v900_v15 = vmul.f32 -1.442695, %v846_v13  ;;  %v1007_v4 = vpop.f32.mrb[19].mxu1 }
0x1744   :  { %1089 = vpow2.f32 %v900_v15 }
0x174e   :  { %v1090_v16 = vpop.eup %1089 }
0x174f   :  { %v854_v17 = vadd.f32 1.0, %v1090_v16 }
0x1751   :  { %1091 = vrcp.f32 %v854_v17 }
0x175b   :  { %v1092_v18 = vpop.eup %1091 }
0x175c   :  { %857 = vst [vmem:[#allocation10] sm:$0x3] %v1092_v18 }
0x175d   :  { %1192 = shalt.err (!%p1189_p8)
}
0x175e   :  { %s1193_s27 = scalar_lea.hbm %s1466_s6, 32 }
0x175f   :  { %p1194_p9 = scmp.ne.s32.totalorder %s1466_s6, %s1193_s27  ;;  %p1197_p10 = scmp.lt.u32.totalorder %s1193_s27, %s1466_s6 }
0x1761   :  { %p1199_p11 = pnand %p1197_p10, %p1194_p9 }
0x1763   :  { %1202 = shalt.err (!%p1199_p11)
}
0x1764   :  { %867 = dma.vmem_to_hbm [thread:$0]  %s865_s25, 32, %s1466_s6, [#allocation4]  }
0x1765   :  { %1209 = dma.done.wait [#allocation4], 32  }
0x1766   :  { %1210 = vsyncadd [#allocation4], 4294967264 }
0x1767   :  { %871 = vsyncpa [#allocation3], 1 }
0x1768   :  { %872 = vsyncpa [#allocation6], 1 }
0x1769   :  { %873 = vsyncpa [#allocation9], 1 }
0x176a   :  { %874 = vsyncpa [#allocation4], 1 }

</bundles_post_ra>
